<compile_context>
chip_gen: v7x
topology: tpu7x:2x2x1
jax: 0.10.0
libtpu: 0.0.40
codegen_flags: <defaults>
</compile_context>

<pallas_src>
import math

import jax
import jax.numpy as jnp
from jax.experimental import pallas as pl
from jax.experimental.pallas import tpu as pltpu


def _round_up(n, m):
    return ((n + m - 1) // m) * m


def _cdiv(a, b):
    return -(-a // b)


def _mlc_kernel(xt_ref, w1_ref, b1_ref, w2_ref, b2_ref, w3_ref, b3_ref, out_ref):
    # xt_ref: (H, TM) features-major tile -> TM on the lane axis everywhere below.
    xt = xt_ref[...]

    # linear1: (H2, H) @ (H, TM) -> (H2, TM).
    # LHS contracts on its lane axis, RHS on its sublane axis: native MXU layout,
    # no relayout/transpose of the big x tile.
    h = jnp.dot(w1_ref[...], xt, preferred_element_type=jnp.float32) + b1_ref[...]

    # softmax over the (tiny, sublane) feature axis; TM stays lane-dense.
    h = h - jnp.max(h, axis=0, keepdims=True)
    e = jnp.exp(h)
    h = e * pl.reciprocal(jnp.sum(e, axis=0, keepdims=True))

    # linear2 + softmax: (H3, H2) @ (H2, TM) -> (H3, TM)
    h = jnp.dot(w2_ref[...], h, preferred_element_type=jnp.float32) + b2_ref[...]
    h = h - jnp.max(h, axis=0, keepdims=True)
    e = jnp.exp(h)
    h = e * pl.reciprocal(jnp.sum(e, axis=0, keepdims=True))

    # linear3: (1, H3) @ (H3, TM) -> (1, TM), lane-dense store.
    out_ref[...] = (
        jnp.dot(w3_ref[...], h, preferred_element_type=jnp.float32) + b3_ref[...]
    )


def multi_linear_classifier_fm(x_t, params, *, block_rows=32768):
    """Features-major entry point.

    x_t: (hidden, M) float32 (one column per sample row).  Returns (M,) float32.
    This is the preferred entry: upstream producers should emit (hidden, M)
    directly so no transpose pass over x is needed anywhere.
    """
    w1, b1, w2, b2, w3, b3 = params
    hidden, m = x_t.shape

    # Row tile (lane extent): multiple of 128, as large as VMEM comfortably allows.
    block_rows = max(128, _round_up(block_rows, 128))
    tm = min(block_rows, _round_up(m, 128))
    # Keep >= 2 tiles when there is enough work so the "parallel" grid axis can
    # shard tiles across both v7x TensorCores (weights are tiny; duplication is free).
    if m > 256 and _cdiv(m, tm) < 2:
        tm = _round_up(_cdiv(m, 2), 128)
    num_tiles = _cdiv(m, tm)  # ragged last tile handled by Pallas; no jnp.pad copy.

    # VMEM budget from the PADDED footprints (v7x has only 64 MiB per TensorCore):
    #   x tile  : round_up(hidden, 8) x tm f32, double-buffered (lane-dense, no
    #             128-lane padding since tm is the lane axis)
    #   out tile: (1 -> 8 sublanes) x tm f32, double-buffered
    # plus headroom for resident weights and spills of the (feat, TM) intermediates.
    x_bytes = _round_up(hidden, 8) * tm * 4
    out_bytes = 8 * tm * 4
    vmem_limit = min(
        48 * 1024 * 1024,                                   # v7x-safe ceiling
        max(32 * 1024 * 1024, 4 * (x_bytes + out_bytes) + 16 * 1024 * 1024),
    )

    out = pl.pallas_call(
        _mlc_kernel,
        out_shape=jax.ShapeDtypeStruct((num_tiles, tm), jnp.float32),
        grid=(num_tiles,),
        in_specs=[
            pl.BlockSpec((hidden, tm), lambda i: (0, i)),   # dense, pipelined x tile
            pl.BlockSpec(w1.shape, lambda i: (0, 0)),       # resident weights/biases
            pl.BlockSpec(b1.shape, lambda i: (0, 0)),
            pl.BlockSpec(w2.shape, lambda i: (0, 0)),
            pl.BlockSpec(b2.shape, lambda i: (0, 0)),
            pl.BlockSpec(w3.shape, lambda i: (0, 0)),
            pl.BlockSpec(b3.shape, lambda i: (0, 0)),
        ],
        out_specs=pl.BlockSpec((1, tm), lambda i: (i, 0)),   # lane-dense store
        compiler_params=pltpu.CompilerParams(
            dimension_semantics=("parallel",),
            vmem_limit_bytes=vmem_limit,
        ),
    )(x_t, w1, b1, w2, b2, w3, b3)

    # Tail columns of the last (ragged) tile are garbage and get sliced off here.
    return out.reshape(-1)[:m]


def multi_linear_classifier(x, params, *, block_rows=32768):
    """x: [..., hidden] float32 (PyTorch layout). Returns [...] float32."""
    lead_shape = x.shape[:-1]
    hidden = x.shape[-1]
    m = 1
    for d in lead_shape:
        m *= d
    # One XLA transpose pass to the features-major layout the kernel wants.
    # TODO(synk): skip this by having the producer emit (hidden, M) and calling
    # multi_linear_classifier_fm directly (it is the biggest remaining HBM cost).
    x_t = jnp.transpose(x.reshape(m, hidden).astype(jnp.float32))
    y = multi_linear_classifier_fm(x_t, params, block_rows=block_rows)
    return y.reshape(lead_shape)  # final .squeeze(-1)


def init_params(key, hidden_size):
    """Deterministic init matching nn.Linear: U(-1/sqrt(in), 1/sqrt(in)).
    Weights stored PyTorch-style as (out, in); biases as (out, 1)."""
    h1 = hidden_size
    h2 = int(hidden_size / 2)
    h3 = int(hidden_size / 6)
    dims = [(h1, h2), (h2, h3), (h3, 1)]
    params = []
    for (din, dout) in dims:
        key, kw, kb = jax.random.split(key, 3)
        bound = 1.0 / math.sqrt(din)
        w = jax.random.uniform(kw, (dout, din), jnp.float32, -bound, bound)
        b = jax.random.uniform(kb, (dout, 1), jnp.float32, -bound, bound)
        params.extend([w, b])
    return tuple(params)


def _reference(x, params):
    w1, b1, w2, b2, w3, b3 = params
    h = x @ w1.T + b1[:, 0]
    h = jax.nn.softmax(h, axis=-1)
    h = h @ w2.T + b2[:, 0]
    h = jax.nn.softmax(h, axis=-1)
    h = h @ w3.T + b3[:, 0]
    return h[..., 0]


if __name__ == "__main__":
    hidden_size = 24  # -> linear dims 24 -> 12 -> 4 -> 1
    batch, seq = 2, 8

    key = jax.random.PRNGKey(0)
    key, kx = jax.random.split(key)
    x = jax.random.normal(kx, (batch, seq, hidden_size), dtype=jnp.float32)
    params = init_params(key, hidden_size)

    out = multi_linear_classifier(x, params)
    out = jax.block_until_ready(out)

    ref = _reference(x, params)
    assert out.shape == (batch, seq), out.shape
    assert jnp.allclose(out, ref, atol=1e-5, rtol=1e-5), (out, ref)
    print("KERNEL_OK")
</pallas_src>

<mosaic_0001>
module attributes {stable_mosaic.version = 11 : i64} {
  func.func @_mlc_kernel(%arg0: i32, %arg1: memref<24x128xf32, #tpu.memory_space<vmem>>, %arg2: memref<12x24xf32, #tpu.memory_space<vmem>>, %arg3: memref<12x1xf32, #tpu.memory_space<vmem>>, %arg4: memref<4x12xf32, #tpu.memory_space<vmem>>, %arg5: memref<4x1xf32, #tpu.memory_space<vmem>>, %arg6: memref<1x4xf32, #tpu.memory_space<vmem>>, %arg7: memref<1x1xf32, #tpu.memory_space<vmem>>, %arg8: memref<1x128xf32, #tpu.memory_space<vmem>>) attributes {dimension_semantics = [#tpu.dimension_semantics<parallel>], iteration_bounds = array<i64: 1>, scalar_prefetch = 0 : i64, scratch_operands = 0 : i64, tpu.core_type = #tpu.core_type<tc>, window_params = [{transform_indices = @transform_0, window_bounds = array<i64: 24, 128>}, {pipeline_mode = #tpu.pipeline_mode<synchronous>, transform_indices = @transform_1, window_bounds = array<i64: 12, 24>}, {pipeline_mode = #tpu.pipeline_mode<synchronous>, transform_indices = @transform_2, window_bounds = array<i64: 12, 1>}, {pipeline_mode = #tpu.pipeline_mode<synchronous>, transform_indices = @transform_3, window_bounds = array<i64: 4, 12>}, {pipeline_mode = #tpu.pipeline_mode<synchronous>, transform_indices = @transform_4, window_bounds = array<i64: 4, 1>}, {pipeline_mode = #tpu.pipeline_mode<synchronous>, transform_indices = @transform_5, window_bounds = array<i64: 1, 4>}, {pipeline_mode = #tpu.pipeline_mode<synchronous>, transform_indices = @transform_6, window_bounds = array<i64: 1, 1>}, {transform_indices = @transform_7, window_bounds = array<i64: 1, 128>}]} {
    %c0 = arith.constant 0 : index
    %c0_0 = arith.constant 0 : index
    %0 = vector.load %arg1[%c0, %c0_0] : memref<24x128xf32, #tpu.memory_space<vmem>>, vector<24x128xf32>
    %c0_1 = arith.constant 0 : index
    %c0_2 = arith.constant 0 : index
    %1 = vector.load %arg2[%c0_1, %c0_2] : memref<12x24xf32, #tpu.memory_space<vmem>>, vector<12x24xf32>
    %cst = arith.constant dense<0.000000e+00> : vector<12x128xf32>
    %2 = tpu.matmul %1, %0, %cst {dimension_numbers = #tpu.dot_dimension_numbers<[1], [0], [0], [1], [0, 0, 1, 1], [], []>} : vector<12x24xf32>, vector<24x128xf32>, vector<12x128xf32> -> vector<12x128xf32>
    %c0_3 = arith.constant 0 : index
    %c0_4 = arith.constant 0 : index
    %3 = vector.load %arg3[%c0_3, %c0_4] : memref<12x1xf32, #tpu.memory_space<vmem>>, vector<12x1xf32>
    %4 = vector.broadcast %3 : vector<12x1xf32> to vector<12x128xf32>
    %5 = arith.addf %2, %4 : vector<12x128xf32>
    %cst_5 = arith.constant dense<0xFF800000> : vector<128xf32>
    %6 = vector.multi_reduction <maximumf>, %5, %cst_5 [0] : vector<12x128xf32> to vector<128xf32>
    %7 = vector.shape_cast %6 : vector<128xf32> to vector<1x128xf32>
    %8 = vector.broadcast %7 : vector<1x128xf32> to vector<12x128xf32>
    %9 = arith.subf %5, %8 : vector<12x128xf32>
    %10 = math.exp %9 : vector<12x128xf32>
    %cst_6 = arith.constant dense<0.000000e+00> : vector<128xf32>
    %11 = vector.multi_reduction <add>, %10, %cst_6 [0] : vector<12x128xf32> to vector<128xf32>
    %12 = vector.shape_cast %11 : vector<128xf32> to vector<1x128xf32>
    %13 = tpu.reciprocal %12 : vector<1x128xf32> -> vector<1x128xf32>
    %14 = vector.broadcast %13 : vector<1x128xf32> to vector<12x128xf32>
    %15 = arith.mulf %10, %14 : vector<12x128xf32>
    %c0_7 = arith.constant 0 : index
    %c0_8 = arith.constant 0 : index
    %16 = vector.load %arg4[%c0_7, %c0_8] : memref<4x12xf32, #tpu.memory_space<vmem>>, vector<4x12xf32>
    %cst_9 = arith.constant dense<0.000000e+00> : vector<4x128xf32>
    %17 = tpu.matmul %16, %15, %cst_9 {dimension_numbers = #tpu.dot_dimension_numbers<[1], [0], [0], [1], [0, 0, 1, 1], [], []>} : vector<4x12xf32>, vector<12x128xf32>, vector<4x128xf32> -> vector<4x128xf32>
    %c0_10 = arith.constant 0 : index
    %c0_11 = arith.constant 0 : index
    %18 = vector.load %arg5[%c0_10, %c0_11] : memref<4x1xf32, #tpu.memory_space<vmem>>, vector<4x1xf32>
    %19 = vector.broadcast %18 : vector<4x1xf32> to vector<4x128xf32>
    %20 = arith.addf %17, %19 : vector<4x128xf32>
    %cst_12 = arith.constant dense<0xFF800000> : vector<128xf32>
    %21 = vector.multi_reduction <maximumf>, %20, %cst_12 [0] : vector<4x128xf32> to vector<128xf32>
    %22 = vector.shape_cast %21 : vector<128xf32> to vector<1x128xf32>
    %23 = vector.broadcast %22 : vector<1x128xf32> to vector<4x128xf32>
    %24 = arith.subf %20, %23 : vector<4x128xf32>
    %25 = math.exp %24 : vector<4x128xf32>
    %cst_13 = arith.constant dense<0.000000e+00> : vector<128xf32>
    %26 = vector.multi_reduction <add>, %25, %cst_13 [0] : vector<4x128xf32> to vector<128xf32>
    %27 = vector.shape_cast %26 : vector<128xf32> to vector<1x128xf32>
    %28 = tpu.reciprocal %27 : vector<1x128xf32> -> vector<1x128xf32>
    %29 = vector.broadcast %28 : vector<1x128xf32> to vector<4x128xf32>
    %30 = arith.mulf %25, %29 : vector<4x128xf32>
    %c0_14 = arith.constant 0 : index
    %c0_15 = arith.constant 0 : index
    %31 = vector.load %arg6[%c0_14, %c0_15] : memref<1x4xf32, #tpu.memory_space<vmem>>, vector<1x4xf32>
    %cst_16 = arith.constant dense<0.000000e+00> : vector<1x128xf32>
    %32 = tpu.matmul %31, %30, %cst_16 {dimension_numbers = #tpu.dot_dimension_numbers<[1], [0], [0], [1], [0, 0, 1, 1], [], []>} : vector<1x4xf32>, vector<4x128xf32>, vector<1x128xf32> -> vector<1x128xf32>
    %c0_17 = arith.constant 0 : index
    %c0_18 = arith.constant 0 : index
    %33 = vector.load %arg7[%c0_17, %c0_18] : memref<1x1xf32, #tpu.memory_space<vmem>>, vector<1x1xf32>
    %34 = vector.broadcast %33 : vector<1x1xf32> to vector<1x128xf32>
    %35 = arith.addf %32, %34 : vector<1x128xf32>
    %c0_19 = arith.constant 0 : index
    %c0_20 = arith.constant 0 : index
    %36 = vector.load %arg8[%c0_19, %c0_20] : memref<1x128xf32, #tpu.memory_space<vmem>>, vector<1x128xf32>
    tpu.vector_store %arg8[%c0_19, %c0_20], %35 {strides = array<i32>} : memref<1x128xf32, #tpu.memory_space<vmem>>, vector<1x128xf32>,
    return
  }
  func.func @transform_0(%arg0: i32) -> (i32, i32) {
    %c0_i32 = arith.constant 0 : i32
    %c0_i32_0 = arith.constant 0 : i32
    return %c0_i32, %arg0 : i32, i32
  }
  func.func @transform_1(%arg0: i32) -> (i32, i32) {
    %c0_i32 = arith.constant 0 : i32
    %c0_i32_0 = arith.constant 0 : i32
    %c0_i32_1 = arith.constant 0 : i32
    return %c0_i32, %c0_i32_0 : i32, i32
  }
  func.func @transform_2(%arg0: i32) -> (i32, i32) {
    %c0_i32 = arith.constant 0 : i32
    %c0_i32_0 = arith.constant 0 : i32
    %c0_i32_1 = arith.constant 0 : i32
    return %c0_i32, %c0_i32_0 : i32, i32
  }
  func.func @transform_3(%arg0: i32) -> (i32, i32) {
    %c0_i32 = arith.constant 0 : i32
    %c0_i32_0 = arith.constant 0 : i32
    %c0_i32_1 = arith.constant 0 : i32
    return %c0_i32, %c0_i32_0 : i32, i32
  }
  func.func @transform_4(%arg0: i32) -> (i32, i32) {
    %c0_i32 = arith.constant 0 : i32
    %c0_i32_0 = arith.constant 0 : i32
    %c0_i32_1 = arith.constant 0 : i32
    return %c0_i32, %c0_i32_0 : i32, i32
  }
  func.func @transform_5(%arg0: i32) -> (i32, i32) {
    %c0_i32 = arith.constant 0 : i32
    %c0_i32_0 = arith.constant 0 : i32
    %c0_i32_1 = arith.constant 0 : i32
    return %c0_i32, %c0_i32_0 : i32, i32
  }
  func.func @transform_6(%arg0: i32) -> (i32, i32) {
    %c0_i32 = arith.constant 0 : i32
    %c0_i32_0 = arith.constant 0 : i32
    %c0_i32_1 = arith.constant 0 : i32
    return %c0_i32, %c0_i32_0 : i32, i32
  }
  func.func @transform_7(%arg0: i32) -> (i32, i32) {
    %c0_i32 = arith.constant 0 : i32
    %c0_i32_0 = arith.constant 0 : i32
    return %arg0, %c0_i32 : i32, i32
  }
}

</mosaic_0001>

<bundles_post_ra>
// kernel: tpu_custom_call.1
= control target key start
LH: loop header
LB: loop body
LE: loop exit
PB: predicated region body
PF: predicated region fallthrough
CT: control target
= control target key end

     0   :  { %s548_s0 = inlined_call_operand.vmem [shape: f32[24,16], index: 0, kind: input, shape index: {}]   ;;  %s549_s1 = inlined_call_operand.vmem [shape: f32[12,24], index: 1, kind: input, shape index: {}]   ;;  %s550_s2 = inlined_call_operand.vmem [shape: f32[12,1], index: 2, kind: input, shape index: {}]   ;;  %s551_s3 = inlined_call_operand.vmem [shape: f32[4,12], index: 3, kind: input, shape index: {}]   ;;  %s552_s4 = inlined_call_operand.vmem [shape: f32[4,1], index: 4, kind: input, shape index: {}]   ;;  %s553_s5 = inlined_call_operand.vmem [shape: f32[1,4], index: 5, kind: input, shape index: {}]   ;;  %s554_s6 = inlined_call_operand.<no memory space> [shape: f32[1,1], index: 6, kind: input, shape index: {}]   ;;  %s555_s7 = inlined_call_operand.hbm [shape: f32[1,128], index: 7, kind: output, shape index: {}]  }
   0x1   :  { %v12_v0 = vstv %s554_s6 }
   0x2   :  { %13 = vst [vmem:[#allocation2] sm:$0x1] %v12_v0 }
   0x3   :  { %v29_v1 = vld [vmem:[%s548_s0] sm:$0xff]  ;;  %v30_v2 = vld [vmem:[%s548_s0 + $0x8] sm:$0xff]  ;;  %vm46_vm0 = vcmask 195584   ;;  %v447_v5 = vmov 0   ;;  %v31_v7 = vld [vmem:[%s548_s0 + $0x10] sm:$0xff] }
   0x4   :  { %v397_v3 = vpack.c.bf16 %v30_v2, %v29_v1  ;;  %v32_v4 = vld [vmem:[%s549_s1] sm:$0xff]  ;;  %411 = vset.pattern.permute.xlu0 %v447_v5  ;;  %v35_v6 = vld [vmem:[%s550_s2 + $0x8] sm:$0xf]  ;;  %412 = vset.pattern.permute.xlu1 %v447_v5 }
   0x5   :  { %382 = vmatprep.mubr.msk.f32.mxu0 %vm46_vm0, %v32_v4  ;;  %43 = vperm.xlu0 %411, %v35_v6  }
   0x6   :  { %14 = vsyncpa [#allocation4], 0  ;;  %398 = vmatprep.subr.bf16.mxu0 %v397_v3  ;;  %v34_v8 = vld [vmem:[%s550_s2] sm:$0xff]  ;;  %v33_v9 = vld [vmem:[%s549_s1 + $0x8] sm:$0xf]  ;;  %v448_v10 = vmov 0.0|0.0  }
   0x7   :  { %400 = vmatpush3.bf16.msra.mxu0 %v397_v3  ;;  %401 = vmatprep.subr.bf16.mxu1 %v448_v10  ;;  %vm449_vm1 = vmmov 0   ;;  %v450_v11 = vmov 0.0   ;;  %v155_v12 = vld [vmem:[%s552_s4] sm:$0xf]  ;;  %vm128_vm2 = vcmask 1043456   ;;  %vm451_vm3 = vmmov 1  }
   0x8   :  { %380 = vmatprep.subr.mxu0 %v31_v7  ;;  %389 = vmatprep.mubr.msk.f32.mxu1 %vm449_vm1, %v450_v11  ;;  %vm403_vm4 = vmpackc.low %vm128_vm2, %vm451_vm3  ;;  %v154_v46 = vld [vmem:[%s551_s3] sm:$0xf]  ;;  %vm161_vm5 = vcmask 97280   ;;  %vm268_vm6 = vcmask 31744   ;;  %s452_s17 = smov [#allocation3]  }
   0x9   :  { %38 = vperm.xlu0 %411, %v34_v8   ;;  %158 = vperm.xlu1 %412, %v155_v12   ;;  %v258_v13 = vld [vmem:[#allocation2] sm:$0x1]  ;;  %s352_s18 = sshll.u32 %s452_s17, 4  ;;  %s353_s18 = int_to_ptr.vmem [resolvable:$true] %s352_s18 }
   0xa   :  { %v257_v6 = vld [vmem:[%s553_s5] sm:$0x1]  ;;  %s423_s19 = scalar_lea.vmem %s353_s18, 16  ;;  %s427_s20 = scalar_lea.vmem %s353_s18, 32 }
   0xb   :  { %381 = vmatpush3.msra.mxu0 %v31_v7  ;;  %v264_v7 = vlaneseq  ;;  %p424_p0 = scmp.ne.s32.totalorder %s353_s18, %s423_s19  ;;  %p428_p1 = scmp.lt.s32.totalorder %s353_s18, %s353_s18 }
   0xc   :  { %383 = vmatmul.mubr.msk.f32.vlgmr.msra.gmra.mrb[0].mxu0 %vm46_vm0, %v33_v9  ;;  %p429_p2 = scmp.lt.s32.totalorder %s427_s20, %s423_s19 }
   0xd   :  { %261 = vperm.xlu1 %412, %v258_v13   ;;  %v265_v8 = vshrl.u32 %v264_v7, 7 }
   0xe   :  { %p430_p3 = por %p429_p2, %p428_p1 }
   0xf   :  { %v266_v9 = vsub.s32 0, %v265_v8 }
  0x10   :  { %p431_p4 = pnand %p430_p3, %p424_p0 }
  0x84   :  { %v44_v14 = vpop.permute.xlu0 %43 }
  0x88   :  { %v39_v16 = vpop.permute.xlu0 %38  ;;  %v159_v47 = vpop.permute.xlu1 %158 }
  0x8c   :  { %v262_v10 = vpop.permute.xlu1 %261 }
  0xdf   :  { %v384_v15 = vpop.f32.mrb[0].mxu0 }
  0xe0   :  { %v125_v17 = vadd.f32 %v384_v15, %v44_v14  ;;  %v119_v18 = vpop.f32.mrb[1].mxu0 }
  0xe1   :  { %v120_v19 = vadd.f32 %v119_v18, %v39_v16 }
  0xe2   :  { %v129_v20 = vsel %vm128_vm2, %v125_v17, -inf }
  0xe3   :  { %v130_v21 = vmax.f32 %v120_v19, %v129_v20 }
  0xe5   :  { %v131_v22 = vrot.slane %v130_v21, 4 }
  0xe7   :  { %v132_v23 = vmax.f32 %v130_v21, %v131_v22 }
  0xe9   :  { %v133_v24 = vrot.slane %v132_v23, 2 }
  0xeb   :  { %v134_v25 = vmax.f32 %v132_v23, %v133_v24 }
  0xed   :  { %v135_v26 = vrot.slane %v134_v25, 1 }
  0xef   :  { %v136_v27 = vmax.f32 %v134_v25, %v135_v26 }
  0xf1   :  { %v137_v28 = vsub.f32 %v120_v19, %v136_v27  ;;  %v138_v29 = vsub.f32 %v125_v17, %v136_v27 }
  0xf3   :  { %v139_v30 = vmul.f32 1.442695, %v137_v28  ;;  %v141_v31 = vmul.f32 1.442695, %v138_v29 }
  0xf5   :  { %413 = vpow2.f32 %v139_v30 }
  0xf6   :  { %415 = vpow2.f32 %v141_v31 }
  0xff   :  { %v414_v32 = vpop.eup %413 }
 0x100   :  { %v416_v33 = vpop.eup %415 }
 0x101   :  { %v143_v34 = vsel %vm128_vm2, %v416_v33, 0.0 }
 0x102   :  { %v144_v35 = vadd.f32 %v414_v32, %v143_v34 }
 0x104   :  { %v145_v36 = vrot.slane %v144_v35, 4 }
 0x106   :  { %v146_v37 = vadd.f32 %v145_v36, %v144_v35 }
 0x108   :  { %v147_v38 = vrot.slane %v146_v37, 2 }
 0x10a   :  { %v148_v39 = vadd.f32 %v147_v38, %v146_v37 }
 0x10c   :  { %v149_v40 = vrot.slane %v148_v39, 1 }
 0x10e   :  { %v150_v41 = vadd.f32 %v149_v40, %v148_v39 }
 0x110   :  { %417 = vrcp.f32 %v150_v41 }
 0x11a   :  { %v418_v42 = vpop.eup %417 }
 0x11b   :  { %v152_v43 = vmul.f32 %v418_v42, %v414_v32  ;;  %v153_v44 = vmul.f32 %v418_v42, %v416_v33 }
 0x11d   :  { %v402_v45 = vpack.c.bf16 %v153_v44, %v152_v43 }
 0x11f   :  { %404 = vmatpush3.bf16.msk.msra.mxu1 %vm403_vm4, %v402_v45 }
 0x120   :  { %392 = vmatprep.subr.mxu1 %v450_v11 }
 0x122   :  { %390 = vmatmul.mubr.msk.f32.vlgmr.msra.gmra.mrb[0].mxu1 %vm161_vm5, %v154_v46 }
 0x123   :  { %394 = vmatprep.mubr.msk.f32.mxu1 %vm449_vm1, %v450_v11  ;;  %v267_v11 = vrot.slane %v262_v10, %v266_v9 }
 0x1f5   :  { %v234_v48 = vpop.f32.mrb[0].mxu1 }
 0x1f6   :  { %v235_v49 = vadd.f32 %v234_v48, %v159_v47  ;;  %v391_v50 = vpop.f32.mrb[1].mxu1 }
 0x1f8   :  { %v238_v51 = vsel %vm128_vm2, %v235_v49, -inf }
 0x1f9   :  { %v239_v52 = vrot.slane %v238_v51, 4 }
 0x1fb   :  { %v240_v53 = vmax.f32 %v238_v51, %v239_v52 }
 0x1fd   :  { %v241_v54 = vrot.slane %v240_v53, 2 }
 0x1ff   :  { %v242_v55 = vmax.f32 %v240_v53, %v241_v54 }
 0x201   :  { %v243_v56 = vrot.slane %v242_v55, 1 }
 0x203   :  { %v244_v57 = vmax.f32 %v242_v55, %v243_v56 }
 0x205   :  { %v245_v58 = vsub.f32 %v235_v49, %v244_v57 }
 0x207   :  { %v246_v59 = vmul.f32 1.442695, %v245_v58 }
 0x209   :  { %419 = vpow2.f32 %v246_v59 }
 0x213   :  { %v420_v60 = vpop.eup %419 }
 0x214   :  { %v248_v61 = vsel %vm128_vm2, %v420_v60, 0.0 }
 0x215   :  { %v249_v62 = vrot.slane %v248_v61, 4 }
 0x217   :  { %v250_v63 = vadd.f32 %v249_v62, %v248_v61 }
 0x219   :  { %v251_v0 = vrot.slane %v250_v63, 2 }
 0x21b   :  { %v252_v1 = vadd.f32 %v251_v0, %v250_v63 }
 0x21d   :  { %v253_v2 = vrot.slane %v252_v1, 1 }
 0x21f   :  { %v254_v3 = vadd.f32 %v253_v2, %v252_v1 }
 0x221   :  { %421 = vrcp.f32 %v254_v3 }
 0x22b   :  { %v422_v4 = vpop.eup %421 }
 0x22c   :  { %v256_v5 = vmul.f32 %v422_v4, %v420_v60 }
 0x22e   :  { %393 = vmatpush3.msk.msra.mxu1 %vm128_vm2, %v256_v5 }
 0x22f   :  { %395 = vmatmul.mubr.msk.f32.vlgmr.msra.gmra.mrb[2].mxu1 %vm268_vm6, %v257_v6 }
 0x302   :  { %v341_v12 = vpop.f32.mrb[2].mxu1 }
 0x303   :  { %v342_v13 = vadd.f32 %v341_v12, %v267_v11  ;;  %v396_v14 = vpop.f32.mrb[3].mxu1 }
 0x305   :  { %345 = vst [vmem:[#allocation3] sm:$0x1] %v342_v13 }
 0x306   :  { %434 = shalt.err (!%p431_p4)
}
 0x307   :  { %s435_s22 = scalar_lea.hbm %s555_s7, 16 }
 0x308   :  { %p436_p5 = scmp.ne.s32.totalorder %s555_s7, %s435_s22  ;;  %p439_p6 = scmp.lt.u32.totalorder %s435_s22, %s555_s7 }
 0x30a   :  { %p441_p7 = pnand %p439_p6, %p436_p5 }
 0x30c   :  { %444 = shalt.err (!%p441_p7)
}
 0x30d   :  { %355 = dma.vmem_to_hbm [thread:$0]  %s353_s18, 16, %s555_s7, [#allocation4]  }
 0x30e   :  { %445 = dma.done.wait [#allocation4], 16  }
 0x30f   :  { %446 = vsyncadd [#allocation4], 4294967280 }
 0x310   :  { %359 = vsyncpa [#allocation4], 1 }

</bundles_post_ra>
